<compile_context>
chip_gen: v6e
topology: v6e:2x2x1
jax: 0.10.0
libtpu: 0.0.40
codegen_flags: <defaults>
</compile_context>

<pallas_src>
import jax
import jax.numpy as jnp
from jax.experimental import pallas as pl
from jax.experimental.pallas import tpu as pltpu

# ----- module dimensions -----
IN_FEATURES = 64          # encoder_embedding_sizes[-1] with 'pooling' aggregation
HID1 = IN_FEATURES // 2   # 32
HID2 = HID1 // 2          # 16
OUTPUT_SIZE = 4

# ----- packed-parameter slab layout (row offsets into the (PACK_ROWS, PACK_COLS) slab) -----
R_W1 = 0                          # W1^T : rows [  0, 64), cols [0, 32)
R_W2 = R_W1 + IN_FEATURES         # W2^T : rows [ 64, 96), cols [0, 16)
R_WL = R_W2 + HID1                # WL^T : rows [ 96,112), cols [0,  4)
R_B1 = R_WL + HID2                # b1   : row  112,       cols [0, 32)
R_B2 = R_B1 + 1                   # b2   : row  113,       cols [0, 16)
R_BL = R_B2 + 1                   # bl   : row  114,       cols [0,  4)
PACK_ROWS = 120                   # 115 rounded up to a multiple of 8 sublanes
PACK_COLS = 128                   # one full lane-register width

# ----- batch tiling -----
TB_LARGE = 2048                   # max rows per grid step (512 KiB f32 input tile)
TB_MIN = 512                      # min rows per grid step (amortizes ~0.35 us/step)
MIN_GRID_STEPS = 8                # keep >=8 steps so v7x's 2 TCs both get work
SINGLE_BLOCK_MAX = TB_LARGE       # up to this batch: one un-gridded block


def pack_decoder_params(w1, b1, w2, b2, wl, bl, dtype=jnp.float32):
    """Pack all decoder parameters into one slab.  Call ONCE at parameter-load time.

    w*: PyTorch layout (out_features, in_features); b*: (out_features,) or (1, out_features).
    Weights are stored transposed so the kernel computes plain x @ W on the MXU.
    Pass dtype=jnp.bfloat16 together with bf16 activations for the mem-bound path.
    """
    p = jnp.zeros((PACK_ROWS, PACK_COLS), dtype)
    p = p.at[R_W1:R_W1 + IN_FEATURES, 0:HID1].set(jnp.asarray(w1).T.astype(dtype))
    p = p.at[R_W2:R_W2 + HID1, 0:HID2].set(jnp.asarray(w2).T.astype(dtype))
    p = p.at[R_WL:R_WL + HID2, 0:OUTPUT_SIZE].set(jnp.asarray(wl).T.astype(dtype))
    p = p.at[R_B1, 0:HID1].set(jnp.asarray(b1).reshape(-1).astype(dtype))
    p = p.at[R_B2, 0:HID2].set(jnp.asarray(b2).reshape(-1).astype(dtype))
    p = p.at[R_BL, 0:OUTPUT_SIZE].set(jnp.asarray(bl).reshape(-1).astype(dtype))
    return p


def decoder_kernel(x_ref, p_ref, o_ref):
    """MLP decoder: (Linear+ReLU) x2 -> Linear -> Sigmoid.

    x_ref : (tb, 64) activation tile.
    p_ref : (120, 128) packed parameter slab (see layout constants above).
    All matmuls accumulate in f32; relu/sigmoid stay in f32 (safe on v5e too).
    """
    f32 = jnp.float32
    cdt = p_ref.dtype                      # MXU operand dtype (f32 or bf16)

    # Static slices of the packed slab (no in-kernel transposes, no extra DMAs).
    w1 = p_ref[R_W1:R_W1 + IN_FEATURES, 0:HID1]
    w2 = p_ref[R_W2:R_W2 + HID1, 0:HID2]
    wl = p_ref[R_WL:R_WL + HID2, 0:OUTPUT_SIZE]
    b1 = p_ref[R_B1:R_B1 + 1, 0:HID1].astype(f32)
    b2 = p_ref[R_B2:R_B2 + 1, 0:HID2].astype(f32)
    bl = p_ref[R_BL:R_BL + 1, 0:OUTPUT_SIZE].astype(f32)

    x = x_ref[...].astype(cdt)

    # layer 0: Linear(64 -> 32) + Dropout(identity at inference) + ReLU
    h = jnp.dot(x, w1, preferred_element_type=f32) + b1
    h = jnp.maximum(h, 0.0)

    # layer 1: Linear(32 -> 16) + Dropout(identity at inference) + ReLU
    h = jnp.dot(h.astype(cdt), w2, preferred_element_type=f32) + b2
    h = jnp.maximum(h, 0.0)

    # last_linear: Linear(16 -> output_size)
    out = jnp.dot(h.astype(cdt), wl, preferred_element_type=f32) + bl

    # softmax_layer == nn.Sigmoid() because criterion == 'BCE'
    o_ref[...] = jax.nn.sigmoid(out).astype(o_ref.dtype)


def _pick_row_tile(batch):
    """Row tile in [TB_MIN, TB_LARGE], multiple of 8, keeping >= MIN_GRID_STEPS steps."""
    tb = max(TB_MIN, min(TB_LARGE, batch // MIN_GRID_STEPS))
    return (tb // 8) * 8


def decoder_forward(x, packed_params):
    """x: (B, 64) activations (f32 or bf16); packed_params: output of pack_decoder_params."""
    B, F = x.shape
    assert F == IN_FEATURES
    out_shape = jax.ShapeDtypeStruct((B, OUTPUT_SIZE), jnp.float32)

    if B <= SINGLE_BLOCK_MAX:
        # Small-batch path: a single block — whole arrays land in VMEM once,
        # one kernel invocation, exactly 2 input DMAs, one dense output store.
        return pl.pallas_call(
            decoder_kernel,
            out_shape=out_shape,
        )(x, packed_params)

    # Large-batch path: tile rows with a cdiv grid (partial last tile is handled
    # by Pallas's masked block writes); the packed params stay resident
    # (same (0, 0) block every step).
    tb = _pick_row_tile(B)
    grid = (pl.cdiv(B, tb),)
    return pl.pallas_call(
        decoder_kernel,
        out_shape=out_shape,
        grid=grid,
        in_specs=[
            pl.BlockSpec((tb, IN_FEATURES), lambda i: (i, 0)),        # x row tile
            pl.BlockSpec((PACK_ROWS, PACK_COLS), lambda i: (0, 0)),   # packed params
        ],
        out_specs=pl.BlockSpec((tb, OUTPUT_SIZE), lambda i: (i, 0)),
        compiler_params=pltpu.CompilerParams(
            dimension_semantics=("parallel",)),                        # v7x: shard across TCs
    )(x, packed_params)


def _xavier_uniform(key, fan_out, fan_in):
    # deterministic xavier_uniform-style init (decoder_init == 'xavier_uniform')
    limit = jnp.sqrt(6.0 / (fan_in + fan_out))
    return jax.random.uniform(key, (fan_out, fan_in), jnp.float32, -limit, limit)


def _reference(x, w1, b1, w2, b2, wl, bl):
    h = jnp.maximum(x @ w1.T + b1, 0.0)
    h = jnp.maximum(h @ w2.T + b2, 0.0)
    return jax.nn.sigmoid(h @ wl.T + bl)


if __name__ == "__main__":
    key = jax.random.PRNGKey(0)
    kx_small, kx_large, k1, k2, k3 = jax.random.split(key, 5)

    # PyTorch-layout (out_features, in_features) weights, zero biases
    # (init_weights sets Linear biases to 0).
    w1 = _xavier_uniform(k1, HID1, IN_FEATURES)
    b1 = jnp.zeros((HID1,), jnp.float32)
    w2 = _xavier_uniform(k2, HID2, HID1)
    b2 = jnp.zeros((HID2,), jnp.float32)
    wl = _xavier_uniform(k3, OUTPUT_SIZE, HID2)
    bl = jnp.zeros((OUTPUT_SIZE,), jnp.float32)

    # Pack / pre-transpose ONCE at parameter-load time (not per forward call).
    packed = jax.block_until_ready(pack_decoder_params(w1, b1, w2, b2, wl, bl))

    # --- small-batch (production) path: single block, 2 input DMAs ---
    x_small = jax.random.normal(kx_small, (16, IN_FEATURES), jnp.float32)
    out_small = jax.block_until_ready(decoder_forward(x_small, packed))
    ref_small = _reference(x_small, w1, b1, w2, b2, wl, bl)
    assert out_small.shape == (16, OUTPUT_SIZE)
    assert jnp.allclose(out_small, ref_small, atol=1e-5, rtol=1e-5)

    # --- large-batch path: cdiv row grid with a partial (masked) last tile ---
    B_LARGE = 4100  # not a multiple of the row tile -> exercises the padded last tile
    x_large = jax.random.normal(kx_large, (B_LARGE, IN_FEATURES), jnp.float32)
    out_large = jax.block_until_ready(decoder_forward(x_large, packed))
    ref_large = _reference(x_large, w1, b1, w2, b2, wl, bl)
    assert out_large.shape == (B_LARGE, OUTPUT_SIZE)
    assert jnp.allclose(out_large, ref_large, atol=1e-5, rtol=1e-5)

    # TODO(synk): Dropout is modeled as identity (inference); training-mode RNG
    # masking (pltpu.prng_seed / prng_random_bits) is not implemented in-kernel.
    print("KERNEL_OK")
</pallas_src>

<mosaic_0001>
module attributes {stable_mosaic.version = 11 : i64} {
  func.func @decoder_kernel(%arg0: memref<16x64xf32, #tpu.memory_space<vmem>>, %arg1: memref<120x128xf32, #tpu.memory_space<vmem>>, %arg2: memref<16x4xf32, #tpu.memory_space<vmem>>) attributes {dimension_semantics = [], scalar_prefetch = 0 : i64, scratch_operands = 0 : i64, tpu.core_type = #tpu.core_type<tc>} {
    %c0 = arith.constant 0 : index
    %c0_0 = arith.constant 0 : index
    %0 = vector.load %arg1[%c0, %c0_0] : memref<120x128xf32, #tpu.memory_space<vmem>>, vector<64x32xf32>
    %c64 = arith.constant 64 : index
    %c0_1 = arith.constant 0 : index
    %1 = vector.load %arg1[%c64, %c0_1] : memref<120x128xf32, #tpu.memory_space<vmem>>, vector<32x16xf32>
    %c96 = arith.constant 96 : index
    %c0_2 = arith.constant 0 : index
    %2 = vector.load %arg1[%c96, %c0_2] : memref<120x128xf32, #tpu.memory_space<vmem>>, vector<16x4xf32>
    %c112 = arith.constant 112 : index
    %c0_3 = arith.constant 0 : index
    %3 = vector.load %arg1[%c112, %c0_3] : memref<120x128xf32, #tpu.memory_space<vmem>>, vector<1x32xf32>
    %c113 = arith.constant 113 : index
    %c0_4 = arith.constant 0 : index
    %4 = vector.load %arg1[%c113, %c0_4] : memref<120x128xf32, #tpu.memory_space<vmem>>, vector<1x16xf32>
    %c114 = arith.constant 114 : index
    %c0_5 = arith.constant 0 : index
    %5 = vector.load %arg1[%c114, %c0_5] : memref<120x128xf32, #tpu.memory_space<vmem>>, vector<1x4xf32>
    %c0_6 = arith.constant 0 : index
    %c0_7 = arith.constant 0 : index
    %6 = vector.load %arg0[%c0_6, %c0_7] : memref<16x64xf32, #tpu.memory_space<vmem>>, vector<16x64xf32>
    %cst = arith.constant dense<0.000000e+00> : vector<16x32xf32>
    %7 = tpu.matmul %6, %0, %cst {dimension_numbers = #tpu.dot_dimension_numbers<[1], [0], [0], [1], [0, 0, 1, 1], [], []>} : vector<16x64xf32>, vector<64x32xf32>, vector<16x32xf32> -> vector<16x32xf32>
    %8 = vector.broadcast %3 : vector<1x32xf32> to vector<16x32xf32>
    %9 = arith.addf %7, %8 : vector<16x32xf32>
    %cst_8 = arith.constant 0.000000e+00 : f32
    %10 = vector.broadcast %cst_8 : f32 to vector<16x32xf32>
    %11 = arith.maximumf %9, %10 : vector<16x32xf32>
    %cst_9 = arith.constant dense<0.000000e+00> : vector<16x16xf32>
    %12 = tpu.matmul %11, %1, %cst_9 {dimension_numbers = #tpu.dot_dimension_numbers<[1], [0], [0], [1], [0, 0, 1, 1], [], []>} : vector<16x32xf32>, vector<32x16xf32>, vector<16x16xf32> -> vector<16x16xf32>
    %13 = vector.broadcast %4 : vector<1x16xf32> to vector<16x16xf32>
    %14 = arith.addf %12, %13 : vector<16x16xf32>
    %cst_10 = arith.constant 0.000000e+00 : f32
    %15 = vector.broadcast %cst_10 : f32 to vector<16x16xf32>
    %16 = arith.maximumf %14, %15 : vector<16x16xf32>
    %cst_11 = arith.constant dense<0.000000e+00> : vector<16x4xf32>
    %17 = tpu.matmul %16, %2, %cst_11 {dimension_numbers = #tpu.dot_dimension_numbers<[1], [0], [0], [1], [0, 0, 1, 1], [], []>} : vector<16x16xf32>, vector<16x4xf32>, vector<16x4xf32> -> vector<16x4xf32>
    %18 = vector.broadcast %5 : vector<1x4xf32> to vector<16x4xf32>
    %19 = arith.addf %17, %18 : vector<16x4xf32>
    %20 = arith.negf %19 : vector<16x4xf32>
    %21 = math.exp %20 : vector<16x4xf32>
    %cst_12 = arith.constant 1.000000e+00 : f32
    %22 = vector.broadcast %cst_12 : f32 to vector<16x4xf32>
    %23 = arith.addf %22, %21 : vector<16x4xf32>
    %24 = arith.divf %22, %23 : vector<16x4xf32>
    %c0_13 = arith.constant 0 : index
    %c0_14 = arith.constant 0 : index
    %25 = vector.load %arg2[%c0_13, %c0_14] : memref<16x4xf32, #tpu.memory_space<vmem>>, vector<16x4xf32>
    tpu.vector_store %arg2[%c0_13, %c0_14], %24 {strides = array<i32>} : memref<16x4xf32, #tpu.memory_space<vmem>>, vector<16x4xf32>,
    return
  }
}

</mosaic_0001>

<bundles_post_ra>
// kernel: tpu_custom_call.1
= control target key start
LH: loop header
LB: loop body
LE: loop exit
PB: predicated region body
PF: predicated region fallthrough
CT: control target
= control target key end

     0   :  { %7 = vsyncpa [#allocation3], 0  ;;  %s498_s0 = inlined_call_operand.hbm [shape: f32[16,64], index: 0, kind: input, shape index: {}]   ;;  %s499_s1 = inlined_call_operand.hbm [shape: f32[120,128], index: 1, kind: input, shape index: {}]   ;;  %s500_s2 = inlined_call_operand.vmem [shape: f32[16,4], index: 2, kind: output, shape index: {}]  }
   0x1   :  { %8 = vsyncpa [#allocation5], 0  ;;  %s465_s9 = smov [#allocation2]  }
   0x2   :  { %s14_s10 = sshll.u32 %s465_s9, 4  ;;  %s15_s10 = int_to_ptr.vmem [resolvable:$true] %s14_s10 }
   0x3   :  { %s429_s11 = scalar_lea.vmem %s15_s10, 256  ;;  %p434_p1 = scmp.lt.s32.totalorder %s15_s10, %s15_s10 }
   0x4   :  { %p430_p0 = scmp.ne.s32.totalorder %s15_s10, %s429_s11  ;;  %p435_p2 = scmp.lt.s32.totalorder %s429_s11, %s429_s11 }
   0x6   :  { %p436_p3 = por %p435_p2, %p434_p1 }
   0x8   :  { %p437_p4 = pnand %p436_p3, %p430_p0 }
   0xa   :  { %440 = shalt.err (!%p437_p4)
}
   0xb   :  { %s466_s12 = smov 128   ;;  %s467_s13 = smov 8  }
   0xc   :  { %20 = dma.hbm_to_vmem [thread:$0]  %s498_s0, 256, %s15_s10, [#allocation3], %s466_s12, %s466_s12, %s467_s13  }
   0xd   :  { %s468_s16 = smov [#allocation4]  }
   0xe   :  { %s26_s17 = sshll.u32 %s468_s16, 4  ;;  %s27_s17 = int_to_ptr.vmem [resolvable:$true] %s26_s17 }
   0xf   :  { %s449_s18 = scalar_lea.vmem %s27_s17, 1920  ;;  %p454_p6 = scmp.lt.s32.totalorder %s27_s17, %s27_s17 }
  0x10   :  { %p450_p5 = scmp.ne.s32.totalorder %s27_s17, %s449_s18  ;;  %p455_p7 = scmp.lt.s32.totalorder %s449_s18, %s449_s18 }
  0x12   :  { %p456_p8 = por %p455_p7, %p454_p6 }
  0x14   :  { %p457_p9 = pnand %p456_p8, %p450_p5 }
  0x16   :  { %460 = shalt.err (!%p457_p9)
}
  0x17   :  { %32 = dma.hbm_to_vmem [thread:$0]  %s499_s1, 1920, %s27_s17, [#allocation5], %s466_s12, %s466_s12, %s467_s13  }
  0x18   :  { %461 = dma.done.wait [#allocation3], 256  }
  0x19   :  { %462 = vsyncadd [#allocation3], 4294967040 }
  0x1a   :  { %463 = dma.done.wait [#allocation5], 1920  }
  0x1b   :  { %464 = vsyncadd [#allocation5], 4294965376  ;;  %v46_v0 = vld [vmem:[#allocation4 + $0x38] sm:$0xff]  ;;  %v45_v1 = vld [vmem:[#allocation4 + $0x30] sm:$0xff]  ;;  %vm62_vm0 = vcmask 523264   ;;  %vm150_vm1 = vcmask 261120  }
  0x1c   :  { %372 = vmatprep.subr.mxu0 %v46_v0  ;;  %v44_v2 = vld [vmem:[#allocation4 + $0x28] sm:$0xff]  ;;  %v56_v3 = vld [vmem:[#allocation2] sm:$0xff]  ;;  %v43_v4 = vld [vmem:[#allocation4 + $0x20] sm:$0xff]  ;;  %vm238_vm2 = vcmask 130048   ;;  %vm332_vm3 = vcmask 31744  }
  0x1d   :  { %373 = vmatpush3.msra.mxu0 %v46_v0  ;;  %388 = vmatprep.mubr.msk.f32.mxu0 %vm62_vm0, %v56_v3  ;;  %v42_v5 = vld [vmem:[#allocation4 + $0x18] sm:$0xff]  ;;  %v41_v6 = vld [vmem:[#allocation4 + $0x10] sm:$0xff]  ;;  %v40_v7 = vld [vmem:[#allocation4 + $0x8] sm:$0xff] }
  0x1e   :  { %374 = vmatprep.subr.mxu0 %v45_v1  ;;  %v39_v8 = vld [vmem:[#allocation4] sm:$0xff]  ;;  %v57_v9 = vld [vmem:[#allocation2 + $0x8] sm:$0xff]  ;;  %v49_v11 = vld [vmem:[#allocation4 + $0x50] sm:$0xff] }
  0x1f   :  { %375 = vmatpush3.msra.mxu0 %v45_v1  ;;  %v50_v10 = vld [vmem:[#allocation4 + $0x58] sm:$0xff]  ;;  %v48_v12 = vld [vmem:[#allocation4 + $0x48] sm:$0xff]  ;;  %v47_v13 = vld [vmem:[#allocation4 + $0x40] sm:$0xff] }
  0x20   :  { %376 = vmatprep.subr.mxu0 %v44_v2  ;;  %391 = vmatprep.subr.mxu1 %v50_v10  ;;  %v341_v14 = vld [vmem:[#allocation4 + $0x70] ss:$0 sm:$0xff]  ;;  %v52_v21 = vld [vmem:[#allocation4 + $0x68] sm:$0xff]  ;;  %v51_v22 = vld [vmem:[#allocation4 + $0x60] sm:$0xff] }
  0x21   :  { %377 = vmatpush3.msra.mxu0 %v44_v2  ;;  %392 = vmatpush3.msra.mxu1 %v50_v10  ;;  %v344_v23 = vld [vmem:[#allocation4 + $0x71] ss:$0 sm:$0xff]  ;;  %v347_v30 = vld [vmem:[#allocation4 + $0x72] ss:$0 sm:$0xff] }
  0x22   :  { %378 = vmatprep.subr.mxu0 %v43_v4  ;;  %393 = vmatprep.subr.mxu1 %v49_v11 }
  0x23   :  { %379 = vmatpush3.msra.mxu0 %v43_v4  ;;  %394 = vmatpush3.msra.mxu1 %v49_v11 }
  0x24   :  { %380 = vmatprep.subr.mxu0 %v42_v5  ;;  %395 = vmatprep.subr.mxu1 %v48_v12 }
  0x25   :  { %381 = vmatpush3.msra.mxu0 %v42_v5  ;;  %396 = vmatpush3.msra.mxu1 %v48_v12 }
  0x26   :  { %382 = vmatprep.subr.mxu0 %v41_v6  ;;  %397 = vmatprep.subr.mxu1 %v47_v13 }
  0x27   :  { %383 = vmatpush3.msra.mxu0 %v41_v6  ;;  %398 = vmatpush3.msra.mxu1 %v47_v13 }
  0x28   :  { %384 = vmatprep.subr.mxu0 %v40_v7  ;;  %402 = vmatprep.subr.mxu1 %v52_v21 }
  0x29   :  { %385 = vmatpush3.msra.mxu0 %v40_v7 }
  0x2a   :  { %386 = vmatprep.subr.mxu0 %v39_v8 }
  0x2b   :  { %387 = vmatpush3.msra.mxu0 %v39_v8 }
  0x2c   :  { %389 = vmatmul.mubr.msk.f32.vlgmr.msra.gmra.mxu0 %vm62_vm0, %v57_v9 }
  0xec   :  { %v390_v15 = vpop.f32.mrf.mxu0 }
  0xed   :  { %v141_v16 = vadd.f32 %v390_v15, %v341_v14 }
  0xee   :  { %v135_v17 = vpop.f32.mrf.mxu0 }
  0xef   :  { %v136_v18 = vadd.f32 %v341_v14, %v135_v17  ;;  %v145_v20 = vmax.f32 %v141_v16, 0.0 }
  0xf1   :  { %v144_v19 = vmax.f32 %v136_v18, 0.0 }
  0xf3   :  { %399 = vmatprep.mubr.msk.f32.mxu1 %vm150_vm1, %v144_v19 }
  0xf4   :  { %400 = vmatmul.mubr.msk.f32.vlgmr.msra.gmra.mxu1 %vm150_vm1, %v145_v20 }
  0xf5   :  { %403 = vmatpush3.msra.mxu1 %v52_v21 }
  0xf6   :  { %404 = vmatprep.subr.mxu1 %v51_v22 }
  0xf7   :  { %405 = vmatpush3.msra.mxu1 %v51_v22 }
 0x1b4   :  { %v401_v24 = vpop.f32.mrf.mxu1 }
 0x1b5   :  { %v229_v25 = vadd.f32 %v401_v24, %v344_v23 }
 0x1b6   :  { %v223_v26 = vpop.f32.mrf.mxu1 }
 0x1b7   :  { %v224_v27 = vadd.f32 %v344_v23, %v223_v26  ;;  %v233_v29 = vmax.f32 %v229_v25, 0.0 }
 0x1b9   :  { %v232_v28 = vmax.f32 %v224_v27, 0.0 }
 0x1bb   :  { %406 = vmatprep.mubr.msk.f32.mxu1 %vm238_vm2, %v232_v28 }
 0x1bc   :  { %407 = vmatmul.mubr.msk.f32.vlgmr.msra.gmra.mxu1 %vm238_vm2, %v233_v29 }
 0x27c   :  { %v408_v31 = vpop.f32.mrf.mxu1 }
 0x27d   :  { %v317_v32 = vadd.f32 %v408_v31, %v347_v30 }
 0x27e   :  { %v311_v33 = vpop.f32.mrf.mxu1 }
 0x27f   :  { %v351_v34 = vmul.f32 -1.442695, %v317_v32  ;;  %v312_v35 = vadd.f32 %v347_v30, %v311_v33 }
 0x281   :  { %413 = vpow2.f32 %v351_v34  ;;  %v350_v36 = vmul.f32 -1.442695, %v312_v35 }
 0x283   :  { %415 = vpow2.f32 %v350_v36 }
 0x28e   :  { %v414_v37 = vpop.eup %413 }
 0x28f   :  { %v327_v38 = vadd.f32 1.0, %v414_v37 }
 0x290   :  { %v416_v39 = vpop.eup %415 }
 0x291   :  { %417 = vrcp.f32 %v327_v38  ;;  %v326_v40 = vadd.f32 1.0, %v416_v39 }
 0x293   :  { %419 = vrcp.f32 %v326_v40 }
 0x29e   :  { %v418_v41 = vpop.eup %417 }
 0x29f   :  { %334 = vst.msk [vmem:[%s500_s2 + $0x8] sm:$0xff] %vm332_vm3, %v418_v41 }
 0x2a0   :  { %v420_v42 = vpop.eup %419 }
 0x2a1   :  { %333 = vst.msk [vmem:[%s500_s2] sm:$0xff] %vm332_vm3, %v420_v42 }
 0x2a2   :  { %339 = vsyncpa [#allocation3], 1 }
 0x2a3   :  { %340 = vsyncpa [#allocation5], 1 }

</bundles_post_ra>
